<compile_context>
chip_gen: v7x
topology: tpu7x:2x2x1
jax: 0.10.0
libtpu: 0.0.40
codegen_flags: <defaults>
</compile_context>

<pallas_src>
import math
import functools

import jax
import jax.numpy as jnp
from jax import lax
from jax.experimental import pallas as pl
from jax.experimental.pallas import tpu as pltpu


# --------------------------------------------------------------------------- parameters
def make_sinusoidal_pe(max_len: int, d_model: int) -> jnp.ndarray:
    """Deterministic buffer setup (matches the PyTorch __init__)."""
    position = jnp.arange(max_len, dtype=jnp.float32)[:, None]            # (max_len, 1)
    div_term = jnp.exp(jnp.arange(0, d_model, 2, dtype=jnp.float32)
                       * (-math.log(10000.0) / d_model))                  # (d_model/2,)
    pe = jnp.zeros((max_len, d_model), dtype=jnp.float32)
    pe = pe.at[:, 0::2].set(jnp.sin(position * div_term))
    pe = pe.at[:, 1::2].set(jnp.cos(position * div_term))
    return pe                                                             # (max_len, d_model)


# --------------------------------------------------------------------------- kernels
def _pe_add_kernel(x_ref, pe_ref, o_ref):
    # x_ref: (tS, tB, D), pe_ref: (tS, 1, D) -> broadcast add over the batch axis.
    o_ref[...] = (x_ref[...] + pe_ref[...]).astype(o_ref.dtype)


def _hash_u32(x):
    """splitmix32-style finalizer on uint32 arrays (fallback path only)."""
    x = x ^ (x >> 16)
    x = x * jnp.uint32(0x7FEB352D)
    x = x ^ (x >> 15)
    x = x * jnp.uint32(0x846CA68B)
    x = x ^ (x >> 16)
    return x


def _pe_dropout_kernel(p_drop, hw_prng, seed_ref, x_ref, pe_ref, o_ref):
    # Broadcast add in x's dtype (pe read once per tile; bf16 stays bf16 on v6e/v7x).
    y = x_ref[...] + pe_ref[...]
    blk = y.shape                                            # (tS, tB, D)

    if hw_prng:
        # Hardware PRNG, seeded per tile -> independent bits per tile, no per-element
        # hash math on the VALU. NOTE: not bit-identical to torch's RNG stream.
        pltpu.prng_seed(seed_ref[0], pl.program_id(0), pl.program_id(1))
        bits = pltpu.prng_random_bits(blk)
        if bits.dtype != jnp.uint32:
            bits = pltpu.bitcast(bits, jnp.uint32)
    else:
        # Interpret-mode / non-TPU fallback: counter-based splitmix32 hash
        # (grid-invariant; counters wrap past 2^32 elements -- fallback only).
        tile_id = pl.program_id(0) * pl.num_programs(1) + pl.program_id(1)
        s_i = lax.broadcasted_iota(jnp.uint32, blk, 0)
        b_i = lax.broadcasted_iota(jnp.uint32, blk, 1)
        d_i = lax.broadcasted_iota(jnp.uint32, blk, 2)
        local = (s_i * jnp.uint32(blk[1]) + b_i) * jnp.uint32(blk[2]) + d_i
        counter = local + tile_id.astype(jnp.uint32) * jnp.uint32(blk[0] * blk[1] * blk[2])
        key = seed_ref[0].astype(jnp.uint32) * jnp.uint32(0x9E3779B9) + jnp.uint32(0x85EBCA6B)
        bits = _hash_u32(counter ^ key)

    thresh = jnp.uint32(min(int(round(p_drop * 2.0 ** 32)), 2 ** 32 - 1))
    keep = bits >= thresh                                    # P(keep) = 1 - p (2^-32 quantized)
    scale = jnp.asarray(1.0 / (1.0 - p_drop), dtype=y.dtype)
    o_ref[...] = jnp.where(keep, y * scale, jnp.zeros_like(y)).astype(o_ref.dtype)


# --------------------------------------------------------------------------- tiling
def _vmem_capacity_bytes() -> int:
    try:
        cap = getattr(pltpu.get_tpu_info(), "vmem_capacity_bytes", None)
        if cap:
            return int(cap)
    except Exception:
        pass
    return 128 * 1024 * 1024                                  # v5e/v6e default


def _choose_tiles(S, B, D, itemsize, vmem_cap):
    """Pick (tS, tB, vmem_limit): double-buffered x/out blocks + the sublane-padded pe
    block must fit the per-generation VMEM budget, with each x block a few MiB."""
    MiB = 1024 * 1024
    vmem_limit = int(min(vmem_cap * 3 // 4, 100 * MiB))       # ~96 MiB v5e/v6e, ~48 MiB v7x
    budget = vmem_limit * 2 // 3                              # headroom for compiler scratch
    x_block_cap = (8 if vmem_cap >= 96 * MiB else 5) * MiB    # per-block x target

    def footprint(ts, tb):
        x_blk = ts * tb * D * itemsize
        pe_blk = ts * 8 * D * itemsize                        # (ts,1,D) pads sublane 1 -> 8
        return 4 * x_blk + 2 * pe_blk                         # x & out (2x each) + pe (2x)

    tB = B
    if B > 8 and footprint(8, B) > budget:
        # Even 8 rows of the full batch are too big: split the batch axis. Multiples of
        # 8 keep the block's second-to-last dim legal and sublane-dense.
        per_row_budget = budget // 8
        pe_per_row = 2 * 8 * D * itemsize
        tB = (per_row_budget - pe_per_row) // (4 * D * itemsize)
        tB = int(max(8, min(B, (tB // 8) * 8)))

    ts_budget = budget // max(1, footprint(1, tB))
    ts_cap = x_block_cap // max(1, tB * D * itemsize)
    tS = int(max(1, min(S, ts_budget, ts_cap)))
    if tS >= 8:
        tS -= tS % 8

    # Give the v7x megacore at least two S-tiles when there is enough work.
    if tS >= S and S >= 16:
        tS = min(S, (((S + 1) // 2 + 7) // 8) * 8)
    return tS, tB, vmem_limit


# --------------------------------------------------------------------------- wrapper
def positional_encoding(x, pe_table, *, dropout_p=0.1, training=False, seed=0,
                        hw_prng=None):
    """x: (S, B, D). pe_table: (max_len, D). Returns (S, B, D) = dropout(x + pe[:S])."""
    S, B, D = x.shape
    p = float(dropout_p)
    pe = pe_table[:S, :].astype(x.dtype).reshape(S, 1, D)     # glue: slice + add bcast axis

    if training and p >= 1.0:                                 # torch Dropout(p=1) zeroes all
        return jnp.zeros_like(x)
    use_dropout = training and p > 0.0

    if hw_prng is None:
        hw_prng = jax.devices()[0].platform == "tpu"          # hash fallback off-TPU

    itemsize = jnp.dtype(x.dtype).itemsize
    tS, tB, vmem_limit = _choose_tiles(S, B, D, itemsize, _vmem_capacity_bytes())
    grid = (pl.cdiv(S, tS), pl.cdiv(B, tB))

    cparams = pltpu.CompilerParams(
        dimension_semantics=("parallel", "parallel"),         # shards grid over 2 TCs on v7x
        vmem_limit_bytes=int(vmem_limit),
    )
    out_shape = jax.ShapeDtypeStruct((S, B, D), x.dtype)

    # D is never split and tB is 8-aligned (or the full batch) -> (8,128) rule holds.
    x_spec = pl.BlockSpec((tS, tB, D), lambda i, j, *_: (i, j, 0))
    pe_spec = pl.BlockSpec((tS, 1, D), lambda i, j, *_: (i, 0, 0))
    o_spec = pl.BlockSpec((tS, tB, D), lambda i, j, *_: (i, j, 0))

    if not use_dropout:
        # Eval-mode (or p == 0): dropout is identity, just the tiled broadcast-add.
        return pl.pallas_call(
            _pe_add_kernel,
            out_shape=out_shape,
            grid_spec=pltpu.PrefetchScalarGridSpec(
                num_scalar_prefetch=0,
                grid=grid,
                in_specs=[x_spec, pe_spec],
                out_specs=o_spec,
            ),
            compiler_params=cparams,
        )(x, pe)

    seed_arr = jnp.asarray([seed], dtype=jnp.int32)
    kernel = functools.partial(_pe_dropout_kernel, p, bool(hw_prng))
    return pl.pallas_call(
        kernel,
        out_shape=out_shape,
        grid_spec=pltpu.PrefetchScalarGridSpec(
            num_scalar_prefetch=1,                            # seed lands in SMEM
            grid=grid,
            in_specs=[x_spec, pe_spec],
            out_specs=o_spec,
        ),
        compiler_params=cparams,
    )(seed_arr, x, pe)


# --------------------------------------------------------------------------- demo / check
if __name__ == "__main__":
    S, B, D = 8, 2, 32          # seq_len, batch, d_model (small demo shapes)
    MAX_LEN = 64

    key = jax.random.PRNGKey(0)
    x = jax.random.normal(key, (S, B, D), dtype=jnp.float32)
    pe_table = make_sinusoidal_pe(MAX_LEN, D)

    # Eval-mode forward (dropout = identity): deterministic, checkable.
    out = positional_encoding(x, pe_table, dropout_p=0.1, training=False)
    out = jax.block_until_ready(out)

    ref = x + pe_table[:S][:, None, :]
    assert out.shape == (S, B, D)
    assert jnp.allclose(out, ref, atol=1e-6), "eval-mode mismatch vs reference"

    # Training-mode forward (inverted dropout).
    out_tr = positional_encoding(x, pe_table, dropout_p=0.1, training=True, seed=123)
    out_tr = jax.block_until_ready(out_tr)
    assert out_tr.shape == (S, B, D)

    # Kept elements must equal (x + pe) / (1 - p); dropped elements are exactly 0.
    scaled = ref / (1.0 - 0.1)
    kept = out_tr != 0
    assert jnp.allclose(jnp.where(kept, out_tr, scaled), scaled, atol=1e-5, rtol=1e-5)
    drop_frac = float(jnp.mean((out_tr == 0).astype(jnp.float32)))
    assert drop_frac < 0.5, f"implausible dropout fraction {drop_frac}"

    print("KERNEL_OK")
</pallas_src>

<mosaic_0001>
module attributes {stable_mosaic.version = 11 : i64} {
  func.func @_pe_add_kernel(%arg0: i32, %arg1: i32, %arg2: memref<8x2x32xf32, #tpu.memory_space<vmem>>, %arg3: memref<8x1x32xf32, #tpu.memory_space<vmem>>, %arg4: memref<8x2x32xf32, #tpu.memory_space<vmem>>) attributes {dimension_semantics = [#tpu.dimension_semantics<parallel>, #tpu.dimension_semantics<parallel>], iteration_bounds = array<i64: 1, 1>, scalar_prefetch = 0 : i64, scratch_operands = 0 : i64, tpu.core_type = #tpu.core_type<tc>, window_params = [{transform_indices = @transform_0, window_bounds = array<i64: 8, 2, 32>}, {transform_indices = @transform_1, window_bounds = array<i64: 8, 1, 32>}, {transform_indices = @transform_2, window_bounds = array<i64: 8, 2, 32>}]} {
    %c0 = arith.constant 0 : index
    %c0_0 = arith.constant 0 : index
    %c0_1 = arith.constant 0 : index
    %0 = vector.load %arg2[%c0, %c0_0, %c0_1] : memref<8x2x32xf32, #tpu.memory_space<vmem>>, vector<8x2x32xf32>
    %c0_2 = arith.constant 0 : index
    %c0_3 = arith.constant 0 : index
    %c0_4 = arith.constant 0 : index
    %1 = vector.load %arg3[%c0_2, %c0_3, %c0_4] : memref<8x1x32xf32, #tpu.memory_space<vmem>>, vector<8x1x32xf32>
    %2 = vector.broadcast %1 : vector<8x1x32xf32> to vector<8x2x32xf32>
    %3 = arith.addf %0, %2 : vector<8x2x32xf32>
    %c0_5 = arith.constant 0 : index
    %c0_6 = arith.constant 0 : index
    %c0_7 = arith.constant 0 : index
    %4 = vector.load %arg4[%c0_5, %c0_6, %c0_7] : memref<8x2x32xf32, #tpu.memory_space<vmem>>, vector<8x2x32xf32>
    tpu.vector_store %arg4[%c0_5, %c0_6, %c0_7], %3 {strides = array<i32>} : memref<8x2x32xf32, #tpu.memory_space<vmem>>, vector<8x2x32xf32>,
    return
  }
  func.func @transform_0(%arg0: i32, %arg1: i32) -> (i32, i32, i32) {
    %c0_i32 = arith.constant 0 : i32
    %c0_i32_0 = arith.constant 0 : i32
    return %arg0, %arg1, %c0_i32 : i32, i32, i32
  }
  func.func @transform_1(%arg0: i32, %arg1: i32) -> (i32, i32, i32) {
    %c0_i32 = arith.constant 0 : i32
    %c0_i32_0 = arith.constant 0 : i32
    %c0_i32_1 = arith.constant 0 : i32
    return %arg0, %c0_i32, %c0_i32_0 : i32, i32, i32
  }
  func.func @transform_2(%arg0: i32, %arg1: i32) -> (i32, i32, i32) {
    %c0_i32 = arith.constant 0 : i32
    %c0_i32_0 = arith.constant 0 : i32
    return %arg0, %arg1, %c0_i32 : i32, i32, i32
  }
}

</mosaic_0001>

<bundles_post_ra>
// kernel: tpu_custom_call.1
= control target key start
LH: loop header
LB: loop body
LE: loop exit
PB: predicated region body
PF: predicated region fallthrough
CT: control target
= control target key end

     0   :  { %7 = vsyncpa [#allocation3], 0  ;;  %s301_s0 = inlined_call_operand.hbm [shape: f32[8,2,32], index: 0, kind: input, shape index: {}]   ;;  %s302_s1 = inlined_call_operand.hbm [shape: f32[8,1,32], index: 1, kind: input, shape index: {}]   ;;  %s303_s2 = inlined_call_operand.hbm [shape: f32[8,2,32], index: 2, kind: output, shape index: {}]  }
   0x1   :  { %8 = vsyncpa [#allocation6], 0 }
   0x2   :  { %9 = vsyncpa [#allocation4], 0  ;;  %s226_s9 = smov [#allocation2]   ;;  %s154_s13 = scalar_lea.hbm %s301_s0, 256 }
   0x3   :  { %s15_s10 = sshll.u32 %s226_s9, 4  ;;  %p155_p0 = scmp.ne.s32.totalorder %s301_s0, %s154_s13  ;;  %s16_s10 = int_to_ptr.vmem [resolvable:$true] %s15_s10 }
   0x4   :  { %p158_p1 = scmp.lt.u32.totalorder %s154_s13, %s301_s0 }
   0x6   :  { %p160_p2 = pnand %p158_p1, %p155_p0 }
   0x8   :  { %163 = shalt.err (!%p160_p2)
}
   0x9   :  { %s164_s18 = scalar_lea.vmem %s16_s10, 256  ;;  %p169_p4 = scmp.lt.s32.totalorder %s16_s10, %s16_s10 }
   0xa   :  { %p165_p3 = scmp.ne.s32.totalorder %s16_s10, %s164_s18  ;;  %p170_p5 = scmp.lt.s32.totalorder %s164_s18, %s164_s18 }
   0xc   :  { %p171_p6 = por %p170_p5, %p169_p4 }
   0xe   :  { %p172_p7 = pnand %p171_p6, %p165_p3 }
  0x10   :  { %175 = shalt.err (!%p172_p7)
}
  0x11   :  { %s227_s19 = smov 32   ;;  %s228_s20 = smov 2  }
  0x12   :  { %21 = dma.hbm_to_vmem [thread:$0]  %s301_s0, 256, %s16_s10, [#allocation3], %s227_s19, %s227_s19, %s228_s20  }
  0x13   :  { %s229_s23 = smov [#allocation5]   ;;  %s176_s27 = scalar_lea.hbm %s302_s1, 128 }
  0x14   :  { %s27_s24 = sshll.u32 %s229_s23, 4  ;;  %p177_p8 = scmp.ne.s32.totalorder %s302_s1, %s176_s27  ;;  %s28_s24 = int_to_ptr.vmem [resolvable:$true] %s27_s24 }
  0x15   :  { %p180_p9 = scmp.lt.u32.totalorder %s176_s27, %s302_s1 }
  0x17   :  { %p182_p10 = pnand %p180_p9, %p177_p8 }
  0x19   :  { %185 = shalt.err (!%p182_p10)
}
  0x1a   :  { %s186_s4 = scalar_lea.vmem %s28_s24, 128  ;;  %p191_p12 = scmp.lt.s32.totalorder %s28_s24, %s28_s24 }
  0x1b   :  { %p187_p11 = scmp.ne.s32.totalorder %s28_s24, %s186_s4  ;;  %p192_p13 = scmp.lt.s32.totalorder %s186_s4, %s186_s4 }
  0x1d   :  { %p193_p0 = por %p192_p13, %p191_p12 }
  0x1f   :  { %p194_p1 = pnand %p193_p0, %p187_p11 }
  0x21   :  { %197 = shalt.err (!%p194_p1)
}
  0x22   :  { %s230_s0 = smov 16   ;;  %s231_s5 = smov 1  }
  0x23   :  { %33 = dma.hbm_to_vmem [thread:$0]  %s302_s1, 128, %s28_s24, [#allocation6], %s230_s0, %s230_s0, %s231_s5  }
  0x24   :  { %220 = dma.done.wait [#allocation3], 256  }
  0x25   :  { %221 = vsyncadd [#allocation3], 4294967040 }
  0x26   :  { %222 = dma.done.wait [#allocation6], 128  }
  0x27   :  { %223 = vsyncadd [#allocation6], 4294967168  ;;  %vm112_vm0 = vcmask 254976   ;;  %s232_s8 = smov [#allocation7]   ;;  %v40_v0 = vld [vmem:[#allocation2] sm:$0x3] }
  0x28   :  { %s275_s9 = sshll.u32 %s232_s8, 4  ;;  %v139_v1 = vld [vmem:[#allocation5] ss:$0 sm:$0xff]  ;;  %v41_v2 = vld [vmem:[#allocation2 + $0x2] sm:$0x3]  ;;  %s127_s9 = int_to_ptr.vmem [resolvable:$true] %s275_s9 }
  0x29   :  { %v104_v3 = vadd.f32 %v139_v1, %v40_v0  ;;  %v140_v4 = vld [vmem:[#allocation5 + $0x1] ss:$0 sm:$0xff]  ;;  %v42_v5 = vld [vmem:[#allocation2 + $0x4] sm:$0x3]  ;;  %v141_v6 = vld [vmem:[#allocation5 + $0x2] ss:$0 sm:$0xff]  ;;  %p203_p3 = scmp.lt.s32.totalorder %s127_s9, %s127_s9 }
  0x2a   :  { %v105_v7 = vadd.f32 %v140_v4, %v41_v2  ;;  %v106_v8 = vadd.f32 %v141_v6, %v42_v5  ;;  %v43_v9 = vld [vmem:[#allocation2 + $0x6] sm:$0x3]  ;;  %v142_v10 = vld [vmem:[#allocation5 + $0x3] ss:$0 sm:$0xff]  ;;  %v44_v11 = vld [vmem:[#allocation2 + $0x8] sm:$0x3] }
  0x2b   :  { %113 = vst.msk [vmem:[#allocation7] sm:$0x3] %vm112_vm0, %v104_v3  ;;  %v107_v12 = vadd.f32 %v142_v10, %v43_v9  ;;  %v143_v13 = vld [vmem:[#allocation5 + $0x4] ss:$0 sm:$0xff]  ;;  %v45_v14 = vld [vmem:[#allocation2 + $0xa] sm:$0x3] }
  0x2c   :  { %v144_v15 = vld [vmem:[#allocation5 + $0x5] ss:$0 sm:$0xff]  ;;  %114 = vst.msk [vmem:[#allocation7 + $0x2] sm:$0x3] %vm112_vm0, %v105_v7  ;;  %115 = vst.msk [vmem:[#allocation7 + $0x4] sm:$0x3] %vm112_vm0, %v106_v8  ;;  %v108_v16 = vadd.f32 %v143_v13, %v44_v11 }
  0x2d   :  { %v109_v17 = vadd.f32 %v144_v15, %v45_v14  ;;  %v46_v18 = vld [vmem:[#allocation2 + $0xc] sm:$0x3]  ;;  %v145_v19 = vld [vmem:[#allocation5 + $0x6] ss:$0 sm:$0xff]  ;;  %v47_v20 = vld [vmem:[#allocation2 + $0xe] sm:$0x3] }
  0x2e   :  { %116 = vst.msk [vmem:[#allocation7 + $0x6] sm:$0x3] %vm112_vm0, %v107_v12  ;;  %v110_v21 = vadd.f32 %v145_v19, %v46_v18  ;;  %v146_v22 = vld [vmem:[#allocation5 + $0x7] ss:$0 sm:$0xff]  ;;  %117 = vst.msk [vmem:[#allocation7 + $0x8] sm:$0x3] %vm112_vm0, %v108_v16 }
  0x2f   :  { %118 = vst.msk [vmem:[#allocation7 + $0xa] sm:$0x3] %vm112_vm0, %v109_v17  ;;  %v111_v23 = vadd.f32 %v146_v22, %v47_v20  ;;  %s198_s1 = scalar_lea.vmem %s127_s9, 256 }
  0x30   :  { %119 = vst.msk [vmem:[#allocation7 + $0xc] sm:$0x3] %vm112_vm0, %v110_v21  ;;  %p199_p2 = scmp.ne.s32.totalorder %s127_s9, %s198_s1  ;;  %p204_p4 = scmp.lt.s32.totalorder %s198_s1, %s198_s1 }
  0x31   :  { %120 = vst.msk [vmem:[#allocation7 + $0xe] sm:$0x3] %vm112_vm0, %v111_v23 }
  0x32   :  { %p205_p5 = por %p204_p4, %p203_p3 }
  0x34   :  { %p206_p6 = pnand %p205_p5, %p199_p2 }
  0x36   :  { %209 = shalt.err (!%p206_p6)
}
  0x37   :  { %s210_s12 = scalar_lea.hbm %s303_s2, 256 }
  0x38   :  { %p211_p7 = scmp.ne.s32.totalorder %s303_s2, %s210_s12  ;;  %p214_p8 = scmp.lt.u32.totalorder %s210_s12, %s303_s2 }
  0x3a   :  { %p216_p9 = pnand %p214_p8, %p211_p7 }
  0x3c   :  { %219 = shalt.err (!%p216_p9)
}
  0x3d   :  { %132 = dma.vmem_to_hbm [thread:$0]  %s127_s9, 256, %s303_s2, [#allocation4], %s227_s19, %s227_s19, %s228_s20  }
  0x3e   :  { %224 = dma.done.wait [#allocation4], 256  }
  0x3f   :  { %225 = vsyncadd [#allocation4], 4294967040 }
  0x40   :  { %136 = vsyncpa [#allocation3], 1 }
  0x41   :  { %137 = vsyncpa [#allocation6], 1 }
  0x42   :  { %138 = vsyncpa [#allocation4], 1 }

</bundles_post_ra>
